<compile_context>
chip_gen: v5e
topology: v5e:2x2
jax: 0.10.0
libtpu: 0.0.40
codegen_flags: <defaults>
</compile_context>

<pallas_src>
import jax
import jax.numpy as jnp
from jax.experimental import pallas as pl
from jax.experimental.pallas import tpu as pltpu


def _round_up(x, m):
    return ((x + m - 1) // m) * m


def _vmem_capacity_bytes():
    """Physical VMEM per TensorCore; conservative 64 MiB fallback."""
    try:
        return int(pltpu.get_tpu_info().vmem_capacity_bytes)
    except Exception:
        return 64 << 20


def _working_set_bytes(tile_m, tile_f, d_model, itemsize):
    """Double-buffered VMEM working set for one grid step + f32 accumulator."""
    dbuf = 2 * itemsize * (
        tile_m * d_model            # x tile
        + d_model * 2 * tile_f      # fused up/gate weight tile
        + 2 * tile_f                # fused bias tile
        + tile_f * d_model          # W2 tile
        + d_model                   # b2
        + tile_m * d_model          # out tile
    )
    return dbuf + tile_m * d_model * 4   # f32 accumulator scratch


# --------------------------------------------------------------------------
# Kernel body
# --------------------------------------------------------------------------
def _swiglu_ffn_kernel(x_ref, wup_ref, bup_ref, w2_ref, b2_ref, o_ref,
                       acc_ref):
    j = pl.program_id(1)

    @pl.when(j == 0)
    def _init():
        # Fold the output bias into the accumulator init (no per-step add).
        acc_ref[...] = jnp.broadcast_to(
            b2_ref[...].astype(jnp.float32), acc_ref.shape)

    # Fused up + gate projection for this ffn tile:
    #   (tile_m, d_model) @ (d_model, 2*tile_f), native dtype in, f32 out.
    hg = jnp.dot(x_ref[...], wup_ref[...],
                 preferred_element_type=jnp.float32)
    hg = hg + bup_ref[...].astype(jnp.float32)
    tf = hg.shape[-1] // 2            # tile_f is a multiple of 128 -> free split
    h = hg[:, :tf]
    g = hg[:, tf:]

    # SwiGLU in f32 on the VPU/EUP.
    s = (h * jax.nn.sigmoid(h)) * g

    # Down projection, accumulated over the ffn reduction axis.
    acc_ref[...] += jnp.dot(s.astype(w2_ref.dtype), w2_ref[...],
                            preferred_element_type=jnp.float32)

    @pl.when(j == pl.num_programs(1) - 1)
    def _finalize():
        o_ref[...] = acc_ref[...].astype(o_ref.dtype)


# --------------------------------------------------------------------------
# One-time weight preparation (hoisted out of the forward path)
# --------------------------------------------------------------------------
def prepare_swiglu_ffn(w1, b1, wg, bg, w2, b2, *, vmem_cap=None):
    """Pad + pack weights once.  Weights are (in, out); biases (out,)."""
    d_model, ffn = w1.shape
    w_itemsize = jnp.dtype(w1.dtype).itemsize

    if vmem_cap is None:
        vmem_cap = _vmem_capacity_bytes()
    small_vmem = vmem_cap < (96 << 20)          # v7x-like (64 MiB/TC)

    tm_target = 512 if small_vmem else 1024     # v7x vs v5e/v6e row tile
    tf_cap = 512 if small_vmem else 2048
    budget = max(16 << 20, vmem_cap - (8 << 20))

    max_nf = _round_up(ffn, 128) // 128

    # Padding-aware tile_f: smallest number of reduction steps whose
    # double-buffered working set fits the VMEM budget; 128-aligned.
    tm = tm_target
    tile_f = None
    while tile_f is None:
        for nf in range(1, max_nf + 1):
            cand = _round_up(-(-ffn // nf), 128)
            if cand > tf_cap:
                continue
            if _working_set_bytes(tm, cand, d_model, w_itemsize) <= budget:
                tile_f = cand
                break
        if tile_f is None:
            if tm <= 64:
                tile_f = 128
            else:
                tm //= 2
    tm_target = tm
    nf = pl.cdiv(ffn, tile_f)
    ffn_pad = nf * tile_f

    pad_f = ffn_pad - ffn
    if pad_f:
        w1 = jnp.pad(w1, ((0, 0), (0, pad_f)))
        wg = jnp.pad(wg, ((0, 0), (0, pad_f)))
        b1 = jnp.pad(b1, ((0, pad_f),))
        bg = jnp.pad(bg, ((0, pad_f),))
        w2 = jnp.pad(w2, ((0, pad_f), (0, 0)))

    # Interleave up + gate weights per ffn tile so every grid step reads one
    # contiguous (d_model, 2*tile_f) slab = [W1_tile | Wg_tile].
    wup = jnp.concatenate(
        [w1.reshape(d_model, nf, 1, tile_f),
         wg.reshape(d_model, nf, 1, tile_f)], axis=2,
    ).reshape(d_model, 2 * ffn_pad)
    bup = jnp.concatenate(
        [b1.reshape(nf, 1, tile_f), bg.reshape(nf, 1, tile_f)], axis=1,
    ).reshape(1, 2 * ffn_pad)
    b2_2d = b2.reshape(1, d_model)

    return {
        "wup": wup, "bup": bup, "w2": w2, "b2": b2_2d,
        "d_model": d_model, "ffn": ffn, "ffn_pad": ffn_pad,
        "tile_f": tile_f, "tm_target": tm_target,
        "small_vmem": small_vmem, "vmem_cap": vmem_cap,
        "w_itemsize": w_itemsize,
    }


# --------------------------------------------------------------------------
# Forward pass
# --------------------------------------------------------------------------
def swiglu_feedforward(x, prep):
    """x: (..., d_model).  prep: output of prepare_swiglu_ffn (built once)."""
    orig_shape = x.shape
    d_model = prep["d_model"]
    dtype = x.dtype
    itemsize = jnp.dtype(dtype).itemsize
    sub = {4: 8, 2: 16, 1: 32}.get(itemsize, 8)   # sublane quantum

    xm = x.reshape(-1, d_model)
    m = xm.shape[0]

    # Row tile: large target (MXU-friendly), clamped/aligned for small m.
    tm_target = prep["tm_target"]
    if prep["small_vmem"] and m >= 512 and m < 2 * tm_target:
        # Keep >=2 row tiles so the "parallel" M axis shards across both
        # v7x TensorCores.
        tm_target = _round_up(-(-m // 2), sub)
    tile_m = max(sub, min(tm_target, _round_up(m, sub)))
    tile_m = _round_up(tile_m, sub)
    m_pad = _round_up(m, tile_m)
    if m_pad != m:
        xm = jnp.pad(xm, ((0, m_pad - m), (0, 0)))

    tile_f = prep["tile_f"]
    ffn_pad = prep["ffn_pad"]
    nf = ffn_pad // tile_f
    n_m = m_pad // tile_m
    grid = (n_m, nf)

    # Honest VMEM budget (the estimate already counts double-buffering),
    # clamped to physical capacity with a little headroom for the compiler.
    w_itemsize = prep["w_itemsize"]
    ws = _working_set_bytes(tile_m, tile_f, d_model, max(itemsize, w_itemsize))
    vmem_limit = int(max(32 << 20,
                         min(prep["vmem_cap"] - (2 << 20), ws + (4 << 20))))

    cost = pl.CostEstimate(
        flops=2 * m_pad * d_model * ffn_pad * 3,          # up + gate + down
        transcendentals=m_pad * ffn_pad,                  # sigmoid
        bytes_accessed=int(
            itemsize * 2 * m_pad * d_model                # x in, out
            + w_itemsize * n_m * (3 * d_model * ffn_pad + 3 * ffn_pad)
            + itemsize * d_model),
    )

    out = pl.pallas_call(
        _swiglu_ffn_kernel,
        out_shape=jax.ShapeDtypeStruct((m_pad, d_model), dtype),
        grid_spec=pltpu.PrefetchScalarGridSpec(
            num_scalar_prefetch=0,
            grid=grid,
            in_specs=[
                pl.BlockSpec((tile_m, d_model), lambda i, j: (i, 0)),      # x
                pl.BlockSpec((d_model, 2 * tile_f), lambda i, j: (0, j)),  # W1||Wg
                pl.BlockSpec((1, 2 * tile_f), lambda i, j: (0, j)),        # b1||bg
                pl.BlockSpec((tile_f, d_model), lambda i, j: (j, 0)),      # W2
                pl.BlockSpec((1, d_model), lambda i, j: (0, 0)),           # b2
            ],
            out_specs=pl.BlockSpec((tile_m, d_model), lambda i, j: (i, 0)),
            scratch_shapes=[pltpu.VMEM((tile_m, d_model), jnp.float32)],
        ),
        compiler_params=pltpu.CompilerParams(
            dimension_semantics=("parallel", "arbitrary"),
            vmem_limit_bytes=vmem_limit),
        cost_estimate=cost,
    )(xm, prep["wup"], prep["bup"], prep["w2"], prep["b2"])

    return out[:m].reshape(orig_shape)


# --------------------------------------------------------------------------
# Reference + test
# --------------------------------------------------------------------------
def _init_linear(key, fan_in, fan_out, dtype=jnp.float32):
    """Deterministic init mimicking nn.Linear (uniform +/- 1/sqrt(fan_in))."""
    kw, kb = jax.random.split(key)
    bound = 1.0 / jnp.sqrt(fan_in)
    w = jax.random.uniform(kw, (fan_in, fan_out), dtype, -bound, bound)
    b = jax.random.uniform(kb, (fan_out,), dtype, -bound, bound)
    return w, b


def reference(x, w1, b1, wg, bg, w2, b2):
    h = x @ w1 + b1
    g = x @ wg + bg
    s = (h * jax.nn.sigmoid(h)) * g
    return s @ w2 + b2


if __name__ == "__main__":
    # Small config: batch=2, seq=8, d_model=32, decoder_ffn_dim=64, dropout=0.0
    batch, seq, d_model, ffn = 2, 8, 32, 64

    key = jax.random.PRNGKey(0)
    kx, k1, kg, k2 = jax.random.split(key, 4)

    x = jax.random.normal(kx, (batch, seq, d_model), jnp.float32)
    w1, b1 = _init_linear(k1, d_model, ffn)
    wg, bg = _init_linear(kg, d_model, ffn)
    w2, b2 = _init_linear(k2, ffn, d_model)

    # One-time weight repack (hoisted out of the forward path).
    prep = prepare_swiglu_ffn(w1, b1, wg, bg, w2, b2)

    out = swiglu_feedforward(x, prep)
    out = jax.block_until_ready(out)

    ref = reference(x, w1, b1, wg, bg, w2, b2)
    assert out.shape == (batch, seq, d_model)
    assert jnp.allclose(out, ref, atol=1e-5, rtol=1e-5), "f32 mismatch vs reference"

    # bf16 tolerance test (native-dtype MXU path downcasts s before W2).
    wb = [a.astype(jnp.bfloat16) for a in (w1, b1, wg, bg, w2, b2)]
    xb = x.astype(jnp.bfloat16)
    prep_b = prepare_swiglu_ffn(*wb)
    out_b = jax.block_until_ready(swiglu_feedforward(xb, prep_b))
    ref_b = reference(xb.astype(jnp.float32),
                      *[a.astype(jnp.float32) for a in wb])
    assert out_b.shape == (batch, seq, d_model)
    assert jnp.allclose(out_b.astype(jnp.float32), ref_b,
                        atol=5e-2, rtol=5e-2), "bf16 mismatch vs reference"

    print("KERNEL_OK")
</pallas_src>

<mosaic_0001>
module attributes {stable_mosaic.version = 11 : i64} {
  func.func @_swiglu_ffn_kernel(%arg0: i32, %arg1: i32, %arg2: memref<16x32xf32, #tpu.memory_space<vmem>>, %arg3: memref<32x256xf32, #tpu.memory_space<vmem>>, %arg4: memref<1x256xf32, #tpu.memory_space<vmem>>, %arg5: memref<128x32xf32, #tpu.memory_space<vmem>>, %arg6: memref<1x32xf32, #tpu.memory_space<vmem>>, %arg7: memref<16x32xf32, #tpu.memory_space<vmem>>, %arg8: memref<16x32xf32, #tpu.memory_space<vmem>>) attributes {dimension_semantics = [#tpu.dimension_semantics<parallel>, #tpu.dimension_semantics<arbitrary>], iteration_bounds = array<i64: 1, 1>, scalar_prefetch = 0 : i64, scratch_operands = 1 : i64, tpu.core_type = #tpu.core_type<tc>, window_params = [{transform_indices = @transform_0, window_bounds = array<i64: 16, 32>}, {transform_indices = @transform_1, window_bounds = array<i64: 32, 256>}, {transform_indices = @transform_2, window_bounds = array<i64: 1, 256>}, {transform_indices = @transform_3, window_bounds = array<i64: 128, 32>}, {pipeline_mode = #tpu.pipeline_mode<synchronous>, transform_indices = @transform_4, window_bounds = array<i64: 1, 32>}, {transform_indices = @transform_5, window_bounds = array<i64: 16, 32>}]} {
    %c0_i32 = arith.constant 0 : i32
    %0 = arith.cmpi eq, %arg1, %c0_i32 : i32
    %1 = arith.extui %0 : i1 to i32
    %c0_i32_0 = arith.constant 0 : i32
    %2 = arith.cmpi ne, %1, %c0_i32_0 : i32
    scf.if %2 {
      %c0_16 = arith.constant 0 : index
      %c0_17 = arith.constant 0 : index
      %26 = vector.load %arg6[%c0_16, %c0_17] : memref<1x32xf32, #tpu.memory_space<vmem>>, vector<1x32xf32>
      %27 = vector.shape_cast %26 : vector<1x32xf32> to vector<1x32xf32>
      %28 = vector.broadcast %27 : vector<1x32xf32> to vector<16x32xf32>
      %c0_18 = arith.constant 0 : index
      %c0_19 = arith.constant 0 : index
      %29 = vector.load %arg8[%c0_18, %c0_19] : memref<16x32xf32, #tpu.memory_space<vmem>>, vector<16x32xf32>
      tpu.vector_store %arg8[%c0_18, %c0_19], %28 {strides = array<i32>} : memref<16x32xf32, #tpu.memory_space<vmem>>, vector<16x32xf32>,
    } else {
    }
    %c0 = arith.constant 0 : index
    %c0_1 = arith.constant 0 : index
    %3 = vector.load %arg2[%c0, %c0_1] : memref<16x32xf32, #tpu.memory_space<vmem>>, vector<16x32xf32>
    %c0_2 = arith.constant 0 : index
    %c0_3 = arith.constant 0 : index
    %4 = vector.load %arg3[%c0_2, %c0_3] : memref<32x256xf32, #tpu.memory_space<vmem>>, vector<32x256xf32>
    %cst = arith.constant dense<0.000000e+00> : vector<16x256xf32>
    %5 = tpu.matmul %3, %4, %cst {dimension_numbers = #tpu.dot_dimension_numbers<[1], [0], [0], [1], [0, 0, 1, 1], [], []>} : vector<16x32xf32>, vector<32x256xf32>, vector<16x256xf32> -> vector<16x256xf32>
    %c0_4 = arith.constant 0 : index
    %c0_5 = arith.constant 0 : index
    %6 = vector.load %arg4[%c0_4, %c0_5] : memref<1x256xf32, #tpu.memory_space<vmem>>, vector<1x256xf32>
    %7 = vector.broadcast %6 : vector<1x256xf32> to vector<16x256xf32>
    %8 = arith.addf %5, %7 : vector<16x256xf32>
    %9 = vector.extract_strided_slice %8 {offsets = [0, 0], sizes = [16, 128], strides = [1, 1]} : vector<16x256xf32> to vector<16x128xf32>
    %10 = vector.extract_strided_slice %8 {offsets = [0, 128], sizes = [16, 128], strides = [1, 1]} : vector<16x256xf32> to vector<16x128xf32>
    %11 = arith.negf %9 : vector<16x128xf32>
    %12 = math.exp %11 : vector<16x128xf32>
    %cst_6 = arith.constant 1.000000e+00 : f32
    %13 = vector.broadcast %cst_6 : f32 to vector<16x128xf32>
    %14 = arith.addf %13, %12 : vector<16x128xf32>
    %15 = arith.divf %13, %14 : vector<16x128xf32>
    %16 = arith.mulf %9, %15 : vector<16x128xf32>
    %17 = arith.mulf %16, %10 : vector<16x128xf32>
    %c0_7 = arith.constant 0 : index
    %c0_8 = arith.constant 0 : index
    %18 = vector.load %arg8[%c0_7, %c0_8] : memref<16x32xf32, #tpu.memory_space<vmem>>, vector<16x32xf32>
    %c0_9 = arith.constant 0 : index
    %c0_10 = arith.constant 0 : index
    %19 = vector.load %arg5[%c0_9, %c0_10] : memref<128x32xf32, #tpu.memory_space<vmem>>, vector<128x32xf32>
    %cst_11 = arith.constant dense<0.000000e+00> : vector<16x32xf32>
    %20 = tpu.matmul %17, %19, %cst_11 {dimension_numbers = #tpu.dot_dimension_numbers<[1], [0], [0], [1], [0, 0, 1, 1], [], []>} : vector<16x128xf32>, vector<128x32xf32>, vector<16x32xf32> -> vector<16x32xf32>
    %21 = arith.addf %18, %20 : vector<16x32xf32>
    %c0_12 = arith.constant 0 : index
    %c0_13 = arith.constant 0 : index
    %22 = vector.load %arg8[%c0_12, %c0_13] : memref<16x32xf32, #tpu.memory_space<vmem>>, vector<16x32xf32>
    tpu.vector_store %arg8[%c0_12, %c0_13], %21 {strides = array<i32>} : memref<16x32xf32, #tpu.memory_space<vmem>>, vector<16x32xf32>,
    %c0_i32_14 = arith.constant 0 : i32
    %23 = arith.cmpi eq, %arg1, %c0_i32_14 : i32
    %24 = arith.extui %23 : i1 to i32
    %c0_i32_15 = arith.constant 0 : i32
    %25 = arith.cmpi ne, %24, %c0_i32_15 : i32
    scf.if %25 {
      %c0_16 = arith.constant 0 : index
      %c0_17 = arith.constant 0 : index
      %26 = vector.load %arg8[%c0_16, %c0_17] : memref<16x32xf32, #tpu.memory_space<vmem>>, vector<16x32xf32>
      %c0_18 = arith.constant 0 : index
      %c0_19 = arith.constant 0 : index
      %27 = vector.load %arg7[%c0_18, %c0_19] : memref<16x32xf32, #tpu.memory_space<vmem>>, vector<16x32xf32>
      tpu.vector_store %arg7[%c0_18, %c0_19], %26 {strides = array<i32>} : memref<16x32xf32, #tpu.memory_space<vmem>>, vector<16x32xf32>,
    } else {
    }
    return
  }
  func.func @transform_0(%arg0: i32, %arg1: i32) -> (i32, i32) {
    %c0_i32 = arith.constant 0 : i32
    %c0_i32_0 = arith.constant 0 : i32
    return %arg0, %c0_i32 : i32, i32
  }
  func.func @transform_1(%arg0: i32, %arg1: i32) -> (i32, i32) {
    %c0_i32 = arith.constant 0 : i32
    %c0_i32_0 = arith.constant 0 : i32
    return %c0_i32, %arg1 : i32, i32
  }
  func.func @transform_2(%arg0: i32, %arg1: i32) -> (i32, i32) {
    %c0_i32 = arith.constant 0 : i32
    %c0_i32_0 = arith.constant 0 : i32
    return %c0_i32, %arg1 : i32, i32
  }
  func.func @transform_3(%arg0: i32, %arg1: i32) -> (i32, i32) {
    %c0_i32 = arith.constant 0 : i32
    %c0_i32_0 = arith.constant 0 : i32
    return %arg1, %c0_i32 : i32, i32
  }
  func.func @transform_4(%arg0: i32, %arg1: i32) -> (i32, i32) {
    %c0_i32 = arith.constant 0 : i32
    %c0_i32_0 = arith.constant 0 : i32
    %c0_i32_1 = arith.constant 0 : i32
    return %c0_i32, %c0_i32_0 : i32, i32
  }
  func.func @transform_5(%arg0: i32, %arg1: i32) -> (i32, i32) {
    %c0_i32 = arith.constant 0 : i32
    %c0_i32_0 = arith.constant 0 : i32
    return %arg0, %c0_i32 : i32, i32
  }
}

</mosaic_0001>

<bundles_post_ra>
// kernel: tpu_custom_call.1
= control target key start
LH: loop header
LB: loop body
LE: loop exit
PB: predicated region body
PF: predicated region fallthrough
CT: control target
= control target key end

     0   :  { %s407_s0 = inlined_call_operand.vmem [shape: f32[16,32], index: 0, kind: input, shape index: {}]   ;;  %s408_s1 = inlined_call_operand.vmem [shape: f32[32,256], index: 1, kind: input, shape index: {}]   ;;  %s409_s2 = inlined_call_operand.vmem [shape: f32[1,256], index: 2, kind: input, shape index: {}]   ;;  %s410_s3 = inlined_call_operand.vmem [shape: f32[128,32], index: 3, kind: input, shape index: {}]   ;;  %s411_s4 = inlined_call_operand.vmem [shape: f32[1,32], index: 4, kind: input, shape index: {}]   ;;  %s412_s5 = inlined_call_operand.hbm [shape: f32[16,32], index: 5, kind: output, shape index: {}]  }
   0x1   :  { %v40_v0 = vld [vmem:[%s408_s1 + $0x30] sm:$0xff]  ;;  %v38_v1 = vld [vmem:[%s408_s1 + $0x20] sm:$0xff]  ;;  %v41_v3 = vld [vmem:[%s408_s1 + $0x38] sm:$0xff] }
   0x2   :  { %67 = vmatpush.msra.mxu0 %v40_v0  ;;  %v36_v2 = vld [vmem:[%s408_s1 + $0x10] sm:$0xff]  ;;  %v39_v4 = vld [vmem:[%s408_s1 + $0x28] sm:$0xff]  ;;  %90 = vmatpush.msra.mxu1 %v41_v3  ;;  %v34_v5 = vld [vmem:[%s408_s1] sm:$0xff] }
   0x3   :  { %v37_v6 = vld [vmem:[%s408_s1 + $0x18] sm:$0xff] }
   0x4   :  { %68 = vmatpush.msra.mxu0 %v38_v1 }
   0x5   :  { %10 = vsyncpa [#allocation4], 0  ;;  %vm29_vm0 = vcmask 261120   ;;  %v32_v7 = vld [vmem:[%s407_s0] sm:$0xff]  ;;  %91 = vmatpush.msra.mxu1 %v39_v4  ;;  %v35_v8 = vld [vmem:[%s408_s1 + $0x8] sm:$0xff]  ;;  %s201_s21 = sshll.u32 %s412_s5, 4  ;;  %s202_s21 = int_to_ptr.hbm [resolvable:$true] %s201_s21 }
   0x6   :  { %69 = vmatpush.msra.mxu0 %v36_v2  ;;  %v33_v9 = vld [vmem:[%s407_s0 + $0x8] sm:$0xff]  ;;  %v160_v10 = vld [vmem:[%s410_s3 + $0x78] sm:$0xff]  ;;  %v159_v11 = vld [vmem:[%s410_s3 + $0x70] sm:$0xff]  ;;  %s274_s22 = smov 128   ;;  %s275_s23 = smov 8  }
   0x7   :  { %92 = vmatpush.msra.mxu1 %v37_v6  ;;  %161 = vmatpush.msra.mxu2 %v160_v10  ;;  %v158_v12 = vld [vmem:[%s410_s3 + $0x68] sm:$0xff]  ;;  %v157_v13 = vld [vmem:[%s410_s3 + $0x60] sm:$0xff]  ;;  %v156_v14 = vld [vmem:[%s410_s3 + $0x58] sm:$0xff] }
   0x8   :  { %70 = vmatpush.msra.mxu0 %v34_v5  ;;  %219 = vmatpush.msra.mxu3 %v160_v10  ;;  %v155_v15 = vld [vmem:[%s410_s3 + $0x50] sm:$0xff]  ;;  %v154_v16 = vld [vmem:[%s410_s3 + $0x48] sm:$0xff]  ;;  %v153_v17 = vld [vmem:[%s410_s3 + $0x40] sm:$0xff] }
   0x9   :  { %213 = vmatmul.msk.f32.vlgmr.msra.gmra.mxu0 %vm29_vm0, %v32_v7  ;;  %93 = vmatpush.msra.mxu1 %v35_v8  ;;  %v152_v18 = vld [vmem:[%s410_s3 + $0x38] sm:$0xff]  ;;  %v151_v19 = vld [vmem:[%s410_s3 + $0x30] sm:$0xff]  ;;  %v150_v20 = vld [vmem:[%s410_s3 + $0x28] sm:$0xff] }
   0xa   :  { %215 = vmatmul.msk.f32.vlgmr.msra.gmra.mxu1 %vm29_vm0, %v32_v7  ;;  %162 = vmatpush.msra.mxu2 %v159_v11  ;;  %v149_v21 = vld [vmem:[%s410_s3 + $0x20] sm:$0xff]  ;;  %v148_v23 = vld [vmem:[%s410_s3 + $0x18] sm:$0xff]  ;;  %v147_v25 = vld [vmem:[%s410_s3 + $0x10] sm:$0xff] }
   0xb   :  { %220 = vmatpush.msra.mxu3 %v159_v11  ;;  %v379_v22 = vld [vmem:[%s409_s2] sm:$0x3]  ;;  %v146_v26 = vld [vmem:[%s410_s3 + $0x8] sm:$0xff] }
   0xc   :  { %163 = vmatpush.msra.mxu2 %v158_v12  ;;  %v44_v24 = vperm.slane %v379_v22, 0  ;;  %v145_v29 = vld [vmem:[%s410_s3] sm:$0xff]  ;;  %v45_v46 = vperm.slane %v379_v22, 1  ;;  %s273_s3 = smov [#allocation3]  }
   0xd   :  { %221 = vmatpush.msra.mxu3 %v158_v12  ;;  %v238_v35 = vld [vmem:[%s411_s4] ss:$0 sm:$0xff]  ;;  %s199_s4 = sshll.u32 %s273_s3, 4  ;;  %s200_s4 = int_to_ptr.vmem [resolvable:$true] %s199_s4 }
   0xe   :  { %164 = vmatpush.msra.mxu2 %v157_v13  ;;  %30 = vst.msk [vmem:[#allocation2] sm:$0xff] %vm29_vm0, %v238_v35 }
   0xf   :  { %222 = vmatpush.msra.mxu3 %v157_v13  ;;  %31 = vst.msk [vmem:[#allocation2 + $0x8] sm:$0xff] %vm29_vm0, %v238_v35 }
  0x10   :  { %165 = vmatpush.msra.mxu2 %v156_v14 }
  0x11   :  { %214 = vmatmul.msk.f32.gmra.mxu0 %vm29_vm0, %v33_v9  ;;  %223 = vmatpush.msra.mxu3 %v156_v14 }
  0x12   :  { %216 = vmatmul.msk.f32.gmra.mxu1 %vm29_vm0, %v33_v9  ;;  %166 = vmatpush.msra.mxu2 %v155_v15 }
  0x13   :  { %224 = vmatpush.msra.mxu3 %v155_v15 }
  0x14   :  { %167 = vmatpush.msra.mxu2 %v154_v16 }
  0x15   :  { %225 = vmatpush.msra.mxu3 %v154_v16  ;;  %v143_v4 = vld [vmem:[#allocation2] sm:$0xff] }
  0x16   :  { %168 = vmatpush.msra.mxu2 %v153_v17  ;;  %v144_v7 = vld [vmem:[#allocation2 + $0x8] sm:$0xff] }
  0x17   :  { %226 = vmatpush.msra.mxu3 %v153_v17 }
  0x18   :  { %169 = vmatpush.msra.mxu2 %v152_v18 }
  0x19   :  { %227 = vmatpush.msra.mxu3 %v152_v18 }
  0x1a   :  { %170 = vmatpush.msra.mxu2 %v151_v19 }
  0x1b   :  { %228 = vmatpush.msra.mxu3 %v151_v19 }
  0x1c   :  { %171 = vmatpush.msra.mxu2 %v150_v20 }
  0x1d   :  { %229 = vmatpush.msra.mxu3 %v150_v20 }
  0x1e   :  { %172 = vmatpush.msra.mxu2 %v149_v21 }
  0x1f   :  { %230 = vmatpush.msra.mxu3 %v149_v21 }
  0x20   :  { %173 = vmatpush.msra.mxu2 %v148_v23 }
  0x21   :  { %231 = vmatpush.msra.mxu3 %v148_v23 }
  0x22   :  { %174 = vmatpush.msra.mxu2 %v147_v25 }
  0x23   :  { %232 = vmatpush.msra.mxu3 %v147_v25 }
  0x24   :  { %175 = vmatpush.msra.mxu2 %v146_v26 }
  0x25   :  { %233 = vmatpush.msra.mxu3 %v146_v26 }
  0x26   :  { %176 = vmatpush.msra.mxu2 %v145_v29 }
  0x27   :  { %234 = vmatpush.msra.mxu3 %v145_v29 }
  0x86   :  { %v72_v27 = vpop.f32.mrf.mxu0 }
  0x87   :  { %v73_v28 = vadd.f32 %v72_v27, %v44_v24  ;;  %v95_v43 = vpop.f32.mrf.mxu1 }
  0x88   :  { %v96_v52 = vadd.f32 %v95_v43, %v45_v46 }
  0x89   :  { %v217_v30 = vmul.f32 -1.442695, %v73_v28 }
  0x8b   :  { %239 = vpow2.f32 %v217_v30 }
  0x8e   :  { %v75_v31 = vpop.f32.mrf.mxu0 }
  0x8f   :  { %v76_v32 = vadd.f32 %v75_v31, %v44_v24  ;;  %v98_v60 = vpop.f32.mrf.mxu1 }
  0x90   :  { %v99_v0 = vadd.f32 %v98_v60, %v45_v46 }
  0x91   :  { %v240_v33 = vpop.eup %239  ;;  %v218_v34 = vmul.f32 -1.442695, %v76_v32 }
  0x92   :  { %v107_v36 = vadd.f32 1.0, %v240_v33 }
  0x93   :  { %241 = vpow2.f32 %v218_v34 }
  0x94   :  { %243 = vrcp.f32 %v107_v36  ;;  %v120_v42 = vand.u32 2147483648, %v107_v36  ;;  %v118_v45 = vand.u32 2147483647, %v107_v36  ;;  %vm114_vm2 = vweird.f32 %v107_v36 }
  0x96   :  { %v121_v49 = vor.u32 1.1754944e-38, %v120_v42  ;;  %vm119_vm4 = vcmp.eq.f32.partialorder %v118_v45, 8.507059e+37 }
  0x99   :  { %v242_v37 = vpop.eup %241 }
  0x9a   :  { %v244_v38 = vpop.eup %243  ;;  %v108_v39 = vadd.f32 1.0, %v242_v37 }
  0x9b   :  { %v110_v40 = vmul.f32 %v244_v38, %v107_v36  ;;  %vm115_vm1 = vweird.f32 %v244_v38 }
  0x9c   :  { %245 = vrcp.f32 %v108_v39  ;;  %vm116_vm3 = vmor %vm114_vm2, %vm115_vm1  ;;  %v135_v56 = vand.u32 2147483648, %v108_v39  ;;  %v133_v58 = vand.u32 2147483647, %v108_v39  ;;  %vm129_vm6 = vweird.f32 %v108_v39 }
  0x9d   :  { %v111_v41 = vsub.f32 1.0, %v110_v40 }
  0x9e   :  { %v136_v62 = vor.u32 1.1754944e-38, %v135_v56  ;;  %vm134_vm8 = vcmp.eq.f32.partialorder %v133_v58, 8.507059e+37 }
  0x9f   :  { %v112_v44 = vmul.f32 %v244_v38, %v111_v41 }
  0xa1   :  { %v113_v47 = vadd.f32 %v244_v38, %v112_v44 }
  0xa2   :  { %v246_v48 = vpop.eup %245 }
  0xa3   :  { %v117_v50 = vsel %vm116_vm3, %v244_v38, %v113_v47  ;;  %v125_v51 = vmul.f32 %v246_v48, %v108_v39  ;;  %vm130_vm5 = vweird.f32 %v246_v48 }
  0xa4   :  { %v122_v53 = vsel %vm119_vm4, %v121_v49, %v117_v50  ;;  %vm131_vm7 = vmor %vm129_vm6, %vm130_vm5 }
  0xa5   :  { %v139_v54 = vmul.f32 %v122_v53, %v73_v28  ;;  %v126_v55 = vsub.f32 1.0, %v125_v51 }
  0xa7   :  { %v127_v57 = vmul.f32 %v246_v48, %v126_v55  ;;  %v141_v59 = vmul.f32 %v139_v54, %v96_v52 }
  0xa9   :  { %v128_v61 = vadd.f32 %v246_v48, %v127_v57  ;;  %177 = vmatmul.f32.vlgmr.msra.gmra.mxu2 %v141_v59 }
  0xab   :  { %v132_v63 = vsel %vm131_vm7, %v246_v48, %v128_v61 }
  0xac   :  { %v137_v1 = vsel %vm134_vm8, %v136_v62, %v132_v63 }
  0xad   :  { %v140_v2 = vmul.f32 %v137_v1, %v76_v32 }
  0xaf   :  { %v142_v3 = vmul.f32 %v140_v2, %v99_v0 }
  0xb1   :  { %180 = vmatmul.f32.vlgmr.msra.gmra.mxu3 %v142_v3 }
 0x12c   :  { %v178_v5 = vpop.f32.mrf.mxu2 }
 0x12d   :  { %v184_v6 = vadd.f32 %v178_v5, %v143_v4 }
 0x12f   :  { %186 = vst.msk [vmem:[#allocation2] sm:$0xff] %vm29_vm0, %v184_v6 }
 0x134   :  { %v181_v8 = vpop.f32.mrf.mxu3 }
 0x135   :  { %v185_v9 = vadd.f32 %v181_v8, %v144_v7 }
 0x136   :  { %v191_v10 = vld [vmem:[#allocation2] sm:$0xff] }
 0x137   :  { %187 = vst.msk [vmem:[#allocation2 + $0x8] sm:$0xff] %vm29_vm0, %v185_v9 }
 0x138   :  { %193 = vst.msk [vmem:[#allocation3] sm:$0xff] %vm29_vm0, %v191_v10 }
 0x13e   :  { %v192_v11 = vld [vmem:[#allocation2 + $0x8] sm:$0xff] }
 0x13f   :  { %194 = vst.msk [vmem:[#allocation3 + $0x8] sm:$0xff] %vm29_vm0, %v192_v11 }
 0x140   :  { %207 = dma.vmem_to_hbm [thread:$0]  %s200_s4, 256, %s202_s21, [#allocation4], %s274_s22, %s274_s22, %s275_s23  }
 0x141   :  { %271 = dma.done.wait [#allocation4], 256  }
 0x142   :  { %272 = vsyncadd [#allocation4], 4294967040 }
 0x143   :  { %212 = vsyncpa [#allocation4], 1 }

</bundles_post_ra>
